<compile_context>
chip_gen: v5e
topology: v5e:2x2
jax: 0.10.0
libtpu: 0.0.40
codegen_flags: <defaults>
</compile_context>

<pallas_src>
import jax
import jax.numpy as jnp
from jax import lax
from jax.experimental import pallas as pl
from jax.experimental.pallas import tpu as pltpu

THRESHOLD = 1 // 20  # == 0, exactly as in the PyTorch module


def _vcm_kernel(x_ref, a_ref, w_ref, b_ref, o_ref):
    # x_ref : (Bblk, Cv, S)  image features (flattened spatial), caller dtype
    # a_ref : (Bblk, T,  S)  attention values, caller dtype
    # w_ref : (Cg, Cv)       Linear weight (out x in), f32
    # b_ref : (Cg, 1)        Linear bias, f32
    # o_ref : (Bblk, Cg, S)  output context, caller dtype
    bblk = x_ref.shape[0]
    S = x_ref.shape[2]
    T = a_ref.shape[1]
    Cg = w_ref.shape[0]
    cdt = x_ref.dtype

    # Hoisted out of the per-sample loop (JAX does not CSE broadcasts).
    w = w_ref[...]                                                 # (Cg, Cv) f32
    bias = jnp.broadcast_to(b_ref[...], (Cg, T))                   # (Cg, T)  f32
    ones_row = jnp.ones((1, S), dtype=cdt)                         # (1, S)

    # `bblk` is a small static int -> this Python loop unrolls at trace time.
    for i in range(bblk):
        x = x_ref[i]                                               # (Cv, S)
        a = a_ref[i]                                               # (T,  S)

        # masked_attention = (A > thresh); {0,1} is exact in bf16/f32.
        m = (a > THRESHOLD).astype(cdt)                            # (T, S)

        # per-token count of active spatial positions, lane-major: (1, T)
        counts = lax.dot_general(
            ones_row, m, (((1,), (1,)), ((), ())),
            preferred_element_type=jnp.float32)                    # (1, T)

        # un-normalized attended visual messages: (Cv, T)
        avm = lax.dot_general(
            x, m, (((1,), (1,)), ((), ())),
            preferred_element_type=jnp.float32)                    # (Cv, T)

        # Linear in natural (M,K)x(K,N) form: (Cg,Cv) x (Cv,T) -> (Cg,T)
        g = lax.dot_general(
            w, avm, (((1,), (0,)), ((), ())),
            preferred_element_type=jnp.float32)                    # (Cg, T)

        # Normalize after the Linear on the small (Cg,T) tile; the reciprocal
        # of a (1,T) vector runs on the EUP (free bundle slot).
        inv = pl.reciprocal(counts, approx=True)                   # (1, T)
        g = jnp.maximum(g * inv + bias, 0.0)                       # (Cg, T)

        # relevant-token mask == (counts > 0); the select also guards
        # counts == 0 (inf/NaN from the reciprocal is discarded -> exact 0).
        g = jnp.where(counts > 0.0, g, 0.0)                        # (Cg, T)

        # context: (Cg,T) x (T,S) -> (Cg,S), natural orientation, bf16 MXU.
        c = lax.dot_general(
            g.astype(cdt), m, (((1,), (0,)), ((), ())),
            preferred_element_type=jnp.float32)                    # (Cg, S)

        o_ref[i] = c.astype(o_ref.dtype)


def _pick_batch_block(B, Cv, T, Cg, S, itemsize):
    """Pick how many batch items each grid step processes.

    Amortizes per-step overhead / tiny DMAs, but keeps at least 2 grid steps
    when B >= 2 so both TensorCores on megacore parts (v7x) get work, and keeps
    the per-step block working set small enough to double-buffer comfortably.
    """
    per_sample = (Cv + T + Cg) * S * itemsize
    budget = 8 << 20  # per-step block bytes budget (leaves room for 2x buffering)
    max_by_vmem = max(1, budget // max(per_sample, 1))
    best = 1
    for d in range(1, B + 1):
        if B % d == 0 and d <= max_by_vmem and (B // d >= 2 or B == 1):
            best = d
    return int(best)


def visual_context_module(image_features, attention_values, weight, bias,
                          *, batch_block=None):
    """image_features: (B, Cv, W, H), attention_values: (B, T, W, H),
    weight: (Cg, Cv), bias: (Cg,). Returns (B, Cg, W, H) in the activations'
    dtype. Activations are NOT upcast to f32 (pass bf16 for best perf)."""
    B, Cv, W, H = image_features.shape
    _, T, _, _ = attention_values.shape
    Cg = weight.shape[0]
    S = W * H

    cdt = jnp.promote_types(image_features.dtype, attention_values.dtype)
    x = image_features.reshape(B, Cv, S).astype(cdt)
    a = attention_values.reshape(B, T, S).astype(cdt)
    w = weight.astype(jnp.float32)
    b = bias.reshape(Cg, 1).astype(jnp.float32)

    itemsize = jnp.dtype(cdt).itemsize
    if batch_block is None:
        batch_block = _pick_batch_block(B, Cv, T, Cg, S, itemsize)
    assert B % batch_block == 0, (B, batch_block)
    grid_b = B // batch_block

    # Explicit VMEM budget: double-buffered in/out blocks + in-kernel
    # intermediates (~the same order again), clamped to [16 MiB, 64 MiB] so the
    # limit is valid on every generation (v7x physical VMEM is 64 MiB).
    per_step = batch_block * (Cv + T + Cg) * S * itemsize
    vmem_limit = int(min(max(4 * per_step + (1 << 20), 16 << 20), 64 << 20))
    # NOTE: for production shapes where the per-item slabs approach this limit,
    # the fallback is an extra S-tile grid axis (accumulate avm/counts over S
    # tiles, then emit c per S tile); not needed at these sizes.

    out = pl.pallas_call(
        _vcm_kernel,
        out_shape=jax.ShapeDtypeStruct((B, Cg, S), cdt),
        grid_spec=pltpu.PrefetchScalarGridSpec(
            num_scalar_prefetch=0,
            grid=(grid_b,),
            in_specs=[
                pl.BlockSpec((batch_block, Cv, S), lambda i: (i, 0, 0)),
                pl.BlockSpec((batch_block, T, S), lambda i: (i, 0, 0)),
                pl.BlockSpec((Cg, Cv), lambda i: (0, 0)),
                pl.BlockSpec((Cg, 1), lambda i: (0, 0)),
            ],
            out_specs=pl.BlockSpec((batch_block, Cg, S), lambda i: (i, 0, 0)),
        ),
        compiler_params=pltpu.CompilerParams(
            dimension_semantics=("parallel",),
            vmem_limit_bytes=vmem_limit),
    )(x, a, w, b)

    return out.reshape(B, Cg, W, H)


def _reference(image_features, attention_values, weight, bias):
    """Plain-JAX f32 reference mirroring the PyTorch forward."""
    B, Cv, W, H = image_features.shape
    T = attention_values.shape[1]
    Cg = weight.shape[0]
    S = W * H
    x = image_features.reshape(B, Cv, S).astype(jnp.float32)
    a = attention_values.reshape(B, T, S).astype(jnp.float32)
    m = (a > THRESHOLD).astype(jnp.float32)
    rmask = (jnp.max(a, axis=2) > THRESHOLD).astype(jnp.float32)       # (B, T)
    avm = jnp.einsum("bcs,bts->bct", x, m,
                     precision=lax.Precision.HIGHEST)                   # (B, Cv, T)
    avm = avm / jnp.sum(m, axis=2)[:, None, :]
    g = jnp.einsum("bct,oc->bto", avm, weight.astype(jnp.float32),
                   precision=lax.Precision.HIGHEST) + bias[None, None, :]
    g = jnp.maximum(g, 0.0)                                             # (B, T, Cg)
    gt = jnp.transpose(g, (0, 2, 1)) * rmask[:, None, :]                # (B, Cg, T)
    c = jnp.einsum("bot,bts->bos", gt, m,
                   precision=lax.Precision.HIGHEST)                     # (B, Cg, S)
    return c.reshape(B, Cg, W, H)


if __name__ == "__main__":
    B, Cv, Cg, T, W, H = 2, 4, 8, 8, 16, 16

    key = jax.random.PRNGKey(0)
    k1, k2, k3, k4 = jax.random.split(key, 4)

    image_features = jax.random.normal(k1, (B, Cv, W, H), dtype=jnp.float32)
    attention_values = jax.random.normal(k2, (B, T, W, H), dtype=jnp.float32)

    # Deterministic init of nn.Linear(Cv, Cg) parameters (synthetic).
    bound = 1.0 / jnp.sqrt(jnp.float32(Cv))
    lin_w = jax.random.uniform(k3, (Cg, Cv), minval=-bound, maxval=bound,
                               dtype=jnp.float32)
    lin_b = jax.random.uniform(k4, (Cg,), minval=-bound, maxval=bound,
                               dtype=jnp.float32)

    # ---- bf16 activations (the recommended fast path) -----------------------
    x_bf16 = image_features.astype(jnp.bfloat16)
    a_bf16 = attention_values.astype(jnp.bfloat16)
    out_bf16 = jax.block_until_ready(
        visual_context_module(x_bf16, a_bf16, lin_w, lin_b))
    ref_bf16 = _reference(x_bf16, a_bf16, lin_w, lin_b)   # same inputs, f32 math
    assert out_bf16.shape == (B, Cg, W, H), out_bf16.shape
    err_bf16 = float(jnp.max(jnp.abs(out_bf16.astype(jnp.float32) - ref_bf16)))
    assert jnp.allclose(out_bf16.astype(jnp.float32), ref_bf16,
                        rtol=2e-2, atol=2e-2), err_bf16

    # ---- f32 activations (dtype-agnostic path) ------------------------------
    out_f32 = jax.block_until_ready(
        visual_context_module(image_features, attention_values, lin_w, lin_b))
    ref_f32 = _reference(image_features, attention_values, lin_w, lin_b)
    err_f32 = float(jnp.max(jnp.abs(out_f32 - ref_f32)))
    assert jnp.allclose(out_f32, ref_f32, rtol=2e-2, atol=2e-2), err_f32

    print("KERNEL_OK")
</pallas_src>

<mosaic_0001>
module attributes {stable_mosaic.version = 11 : i64} {
  func.func @_vcm_kernel(%arg0: i32, %arg1: memref<1x4x256xbf16, #tpu.memory_space<vmem>>, %arg2: memref<1x8x256xbf16, #tpu.memory_space<vmem>>, %arg3: memref<8x4xf32, #tpu.memory_space<vmem>>, %arg4: memref<8x1xf32, #tpu.memory_space<vmem>>, %arg5: memref<1x8x256xbf16, #tpu.memory_space<vmem>>) attributes {dimension_semantics = [#tpu.dimension_semantics<parallel>], iteration_bounds = array<i64: 2>, scalar_prefetch = 0 : i64, scratch_operands = 0 : i64, tpu.core_type = #tpu.core_type<tc>, window_params = [{transform_indices = @transform_0, window_bounds = array<i64: 1, 4, 256>}, {transform_indices = @transform_1, window_bounds = array<i64: 1, 8, 256>}, {pipeline_mode = #tpu.pipeline_mode<synchronous>, transform_indices = @transform_2, window_bounds = array<i64: 8, 4>}, {pipeline_mode = #tpu.pipeline_mode<synchronous>, transform_indices = @transform_3, window_bounds = array<i64: 8, 1>}, {transform_indices = @transform_4, window_bounds = array<i64: 1, 8, 256>}]} {
    %c0 = arith.constant 0 : index
    %c0_0 = arith.constant 0 : index
    %0 = vector.load %arg3[%c0, %c0_0] : memref<8x4xf32, #tpu.memory_space<vmem>>, vector<8x4xf32>
    %c0_1 = arith.constant 0 : index
    %c0_2 = arith.constant 0 : index
    %1 = vector.load %arg4[%c0_1, %c0_2] : memref<8x1xf32, #tpu.memory_space<vmem>>, vector<8x1xf32>
    %2 = vector.shape_cast %1 : vector<8x1xf32> to vector<8x1xf32>
    %3 = vector.broadcast %2 : vector<8x1xf32> to vector<8x8xf32>
    %cst = arith.constant 1.000000e+00 : bf16
    %4 = vector.broadcast %cst : bf16 to vector<1x256xbf16>
    %c0_3 = arith.constant 0 : index
    %c0_4 = arith.constant 0 : index
    %c0_5 = arith.constant 0 : index
    %5 = vector.load %arg1[%c0_3, %c0_4, %c0_5] : memref<1x4x256xbf16, #tpu.memory_space<vmem>>, vector<1x4x256xbf16>
    %6 = vector.shape_cast %5 : vector<1x4x256xbf16> to vector<4x256xbf16>
    %c0_6 = arith.constant 0 : index
    %c0_7 = arith.constant 0 : index
    %c0_8 = arith.constant 0 : index
    %7 = vector.load %arg2[%c0_6, %c0_7, %c0_8] : memref<1x8x256xbf16, #tpu.memory_space<vmem>>, vector<1x8x256xbf16>
    %8 = vector.shape_cast %7 : vector<1x8x256xbf16> to vector<8x256xbf16>
    %cst_9 = arith.constant 0.000000e+00 : bf16
    %9 = vector.broadcast %cst_9 : bf16 to vector<8x256xbf16>
    %10 = arith.cmpf ogt, %8, %9 : vector<8x256xbf16>
    %11 = arith.extui %10 : vector<8x256xi1> to vector<8x256xi32>
    %12 = arith.sitofp %11 : vector<8x256xi32> to vector<8x256xf32>
    %13 = arith.truncf %12 : vector<8x256xf32> to vector<8x256xbf16>
    %cst_10 = arith.constant dense<0.000000e+00> : vector<1x8xf32>
    %14 = tpu.matmul %4, %13, %cst_10 {dimension_numbers = #tpu.dot_dimension_numbers<[1], [1], [0], [0], [0, 0, 1, 0], [], []>} : vector<1x256xbf16>, vector<8x256xbf16>, vector<1x8xf32> -> vector<1x8xf32>
    %cst_11 = arith.constant dense<0.000000e+00> : vector<4x8xf32>
    %15 = tpu.matmul %6, %13, %cst_11 {dimension_numbers = #tpu.dot_dimension_numbers<[1], [1], [0], [0], [0, 0, 1, 0], [], []>} : vector<4x256xbf16>, vector<8x256xbf16>, vector<4x8xf32> -> vector<4x8xf32>
    %cst_12 = arith.constant dense<0.000000e+00> : vector<8x8xf32>
    %16 = tpu.matmul %0, %15, %cst_12 {dimension_numbers = #tpu.dot_dimension_numbers<[1], [0], [0], [1], [0, 0, 1, 1], [], []>} : vector<8x4xf32>, vector<4x8xf32>, vector<8x8xf32> -> vector<8x8xf32>
    %17 = tpu.reciprocal %14 {approx = true} : vector<1x8xf32> -> vector<1x8xf32>
    %18 = vector.broadcast %17 : vector<1x8xf32> to vector<8x8xf32>
    %19 = arith.mulf %16, %18 : vector<8x8xf32>
    %20 = arith.addf %19, %3 : vector<8x8xf32>
    %cst_13 = arith.constant 0.000000e+00 : f32
    %21 = vector.broadcast %cst_13 : f32 to vector<8x8xf32>
    %22 = arith.maximumf %20, %21 : vector<8x8xf32>
    %cst_14 = arith.constant 0.000000e+00 : f32
    %23 = vector.broadcast %cst_14 : f32 to vector<1x8xf32>
    %24 = arith.cmpf ogt, %14, %23 : vector<1x8xf32>
    %cst_15 = arith.constant 0.000000e+00 : f32
    %25 = vector.shape_cast %24 : vector<1x8xi1> to vector<1x8xi1>
    %26 = vector.broadcast %25 : vector<1x8xi1> to vector<8x8xi1>
    %27 = vector.broadcast %cst_15 : f32 to vector<8x8xf32>
    %28 = arith.select %26, %22, %27 : vector<8x8xi1>, vector<8x8xf32>
    %29 = arith.truncf %28 : vector<8x8xf32> to vector<8x8xbf16>
    %cst_16 = arith.constant dense<0.000000e+00> : vector<8x256xf32>
    %30 = tpu.matmul %29, %13, %cst_16 {dimension_numbers = #tpu.dot_dimension_numbers<[1], [0], [0], [1], [0, 0, 1, 1], [], []>} : vector<8x8xbf16>, vector<8x256xbf16>, vector<8x256xf32> -> vector<8x256xf32>
    %31 = arith.truncf %30 : vector<8x256xf32> to vector<8x256xbf16>
    %c0_17 = arith.constant 0 : index
    %c0_18 = arith.constant 0 : index
    %c0_19 = arith.constant 0 : index
    %32 = vector.load %arg5[%c0_17, %c0_18, %c0_19] : memref<1x8x256xbf16, #tpu.memory_space<vmem>>, vector<1x8x256xbf16>
    %33 = vector.shape_cast %32 : vector<1x8x256xbf16> to vector<8x256xbf16>
    %34 = vector.shape_cast %31 : vector<8x256xbf16> to vector<1x8x256xbf16>
    tpu.vector_store %arg5[%c0_17, %c0_18, %c0_19], %34 {strides = array<i32>} : memref<1x8x256xbf16, #tpu.memory_space<vmem>>, vector<1x8x256xbf16>,
    return
  }
  func.func @transform_0(%arg0: i32) -> (i32, i32, i32) {
    %c0_i32 = arith.constant 0 : i32
    %c0_i32_0 = arith.constant 0 : i32
    %c0_i32_1 = arith.constant 0 : i32
    return %arg0, %c0_i32, %c0_i32_0 : i32, i32, i32
  }
  func.func @transform_1(%arg0: i32) -> (i32, i32, i32) {
    %c0_i32 = arith.constant 0 : i32
    %c0_i32_0 = arith.constant 0 : i32
    %c0_i32_1 = arith.constant 0 : i32
    return %arg0, %c0_i32, %c0_i32_0 : i32, i32, i32
  }
  func.func @transform_2(%arg0: i32) -> (i32, i32) {
    %c0_i32 = arith.constant 0 : i32
    %c0_i32_0 = arith.constant 0 : i32
    %c0_i32_1 = arith.constant 0 : i32
    return %c0_i32, %c0_i32_0 : i32, i32
  }
  func.func @transform_3(%arg0: i32) -> (i32, i32) {
    %c0_i32 = arith.constant 0 : i32
    %c0_i32_0 = arith.constant 0 : i32
    %c0_i32_1 = arith.constant 0 : i32
    return %c0_i32, %c0_i32_0 : i32, i32
  }
  func.func @transform_4(%arg0: i32) -> (i32, i32, i32) {
    %c0_i32 = arith.constant 0 : i32
    %c0_i32_0 = arith.constant 0 : i32
    %c0_i32_1 = arith.constant 0 : i32
    return %arg0, %c0_i32, %c0_i32_0 : i32, i32, i32
  }
}

</mosaic_0001>

<bundles_post_ra>
// kernel: tpu_custom_call.1
= control target key start
LH: loop header
LB: loop body
LE: loop exit
PB: predicated region body
PF: predicated region fallthrough
CT: control target
= control target key end

     0   :  { %9 = vsyncpa [#allocation3], 0  ;;  %s864_s0 = inlined_call_operand.hbm [shape: bf16[2,4,256], index: 0, kind: input, shape index: {}]   ;;  %s865_s1 = inlined_call_operand.vmem [shape: bf16[2,8,256], index: 1, kind: input, shape index: {}]   ;;  %s866_s2 = inlined_call_operand.vmem [shape: f32[8,4], index: 2, kind: input, shape index: {}]   ;;  %s867_s3 = inlined_call_operand.vmem [shape: f32[8,1], index: 3, kind: input, shape index: {}]   ;;  %s868_s4 = inlined_call_operand.hbm [shape: bf16[2,8,256], index: 4, kind: output, shape index: {}]  }
   0x1   :  { %11 = vsyncpa [#allocation3 + $0x1], 0 }
   0x2   :  { %12 = vsyncpa [#allocation4], 0 }
   0x3   :  { %14 = vsyncpa [#allocation4 + $0x1], 0  ;;  %s704_s15 = smov 0   ;;  %s706_s16 = smov 0  }
   0x4   :  { %s708_s17 = smov 0   ;;  %s710_s18 = smov 0  }
   0x5 LB: > { %s725_s19 = sadd.s32 4294967295, %s673_s18   ;;  %s491_s20 = sadd.s32 4294967294, %s673_s18   ;;  %s673_s18 = sphi %s710_s18, %s882_s18   ;;  %s669_s17 = sphi %s708_s17, %s881_s17   ;;  %s665_s16 = sphi %s706_s16, %s880_s16   ;;  %s661_s15 = sphi %s704_s15, %s879_s15  }
   0x6   : > { %s729_s21 = sadd.s32 1, %s673_s18   ;;  %s27_s22 = sadd.s32 1, %s669_s17 }
   0x7   : > { %s24_s23 = ssub.s32 %s673_s18, %s729_s21  ;;  %p34_p0 = scmp.ne.s32.totalorder %s669_s17, %s665_s16 }
   0x8   : > { %p25_p1 = scmp.eq.s32.totalorder %s24_s23, 0  ;;  %p35_p2 = scmp.eq.s32.totalorder %s673_s18, 0 }
   0x9   : > { %p40_p3 = scmp.ne.s32.totalorder %s665_s16, %s661_s15  ;;  %p41_p4 = scmp.eq.s32.totalorder %s725_s19, 0 }
   0xa   : > { %s741_s24 = scalar_select %p25_p1, %s669_s17, %s27_s22  }
   0xb   : > { %p743_p5 = por %p35_p2, %p34_p0  ;;  %p747_p6 = por %p41_p4, %p40_p3 }
   0xc   : > { %p132_p7 = scmp.eq.s32.totalorder %s725_s19, 1  ;;  %p138_p8 = scmp.eq.s32.totalorder %s491_s20, 1 }
   0xd   : > { %p536_p10 = scmp.lt.s32.totalorder %s673_s18, 2  ;;  %s164_s29 = sand.u32 1, %s669_s17  }
   0xe   : > { %p754_p11 = por %p132_p7, %p34_p0  ;;  %p758_p12 = por %p138_p8, %p40_p3 }
   0xf   : > { %s521_s30 = sshll.u32 %s673_s18, 2  ;;  %s494_s5 = sshll.u32 %s164_s29, 2 }
  0x10   : > { %s173_s8 = scalar_lea.hbm %s864_s0, %s521_s30  ;;  %s168_s10 = scalar_lea.vmem [#allocation2], %s494_s5 }
  0x11   : > { %s175_s9 = sshll.u32 %s173_s8, 4  ;;  %s177_s11 = sshll.u32 %s168_s10, 4  ;;  %s176_s9 = int_to_ptr.hbm [resolvable:$true] %s175_s9  ;;  %s178_s11 = int_to_ptr.vmem [resolvable:$true] %s177_s11 }
  0x12   : > { %p769_p13 = pnand %p536_p10, %p743_p5  ;;  %p497_p0 = scmp.ge.s32.totalorder %s673_s18, 1 }
  0x13   : > { %p190_p1 = scmp.lt.s32.totalorder %s673_s18, 3  ;;  %s165_s13 = scalar_lea.sflag [#allocation3], %s164_s29 }
  0x14   : > { %s577_s14 = sshra.s32 %s176_s9, 4  ;;  %p581_p3 = pneg %p769_p13  ;;  %s578_s14 = int_to_ptr.hbm [resolvable:$true] %s577_s14 }
  0x15   : > { %s579_s20 = scalar_lea.hbm %s578_s14, 4  ;;  %s584_s25 = scalar_lea.hbm %s864_s0, 8 }
  0x16   : > { %p580_p2 = scmp.ne.s32.totalorder %s578_s14, %s579_s20  ;;  %p585_p5 = scmp.lt.s32.totalorder %s578_s14, %s864_s0 }
  0x17   : > { %p586_p8 = scmp.lt.s32.totalorder %s584_s25, %s579_s20 }
  0x18   : > { %p582_p4 = pnand %p581_p3, %p580_p2 }
  0x19   : > { %p587_p10 = por %p586_p8, %p585_p5 }
  0x1a   : > { %p583_p7 = pneg %p582_p4 }
  0x1c   : > { %p588_p9 = pnand %p587_p10, %p583_p7 }
  0x1e   : > { %591 = shalt.err (!%p588_p9)
}
  0x1f   : > { %531 = dma.hbm_to_vmem [thread:$0]  (!%p769_p13), %s176_s9, 64, %s178_s11, %s165_s13  }
  0x20   : > { %p191_p2 = pnand %p497_p0, %p190_p1 }
  0x21   : > { %s790_s29 = sand.u32 (!%p191_p2), 1, %s665_s16  }
  0x22   : > { %194 = sbr.rel (%p191_p2) target bundleno = 469 (0x1d5), region = 36  ;;  %s498_s6 = sshll.u32 (!%p191_p2), %s790_s29, 2 }
  0x23   : > { %s197_s7 = scalar_lea.sflag (!%p191_p2), [#allocation3], %s790_s29  ;;  %s200_s8 = scalar_lea.vmem (!%p191_p2), [#allocation2], %s498_s6 }
  0x27   : > { %652 = dma.done.wait (%p747_p6), %s197_s7, 64  }
  0x28   : > { %654 = vsyncadd (%p747_p6), %s197_s7, 4294967232  ;;  %p231_p9 = scmp.lt.s32.totalorder %s725_s19, 1  ;;  %v245_v0 = vld [vmem:[%s200_s8] sm:$0xf]  ;;  %v675_v6 = vmov 1.0|1.0  }
  0x29   : > { %284 = vst [vmem:[#allocation1] ss:$4 sm:$0xff] %v245_v0  ;;  %v676_v9 = vmov 1065369472   ;;  %v239_v10 = vld [vmem:[%s867_s3] sm:$0xff]  ;;  %v677_v11 = vmov 0  }
  0x2a   : > { %s232_s9 = scalar_select %p231_p9, %s725_s19, 1  ;;  %574 = vset.pattern.permute.xlu0 %v677_v11  ;;  %vm319_vm5 = vcmask 1043456   ;;  %v238_v19 = vld [vmem:[%s866_s2] sm:$0xff]  ;;  %vm315_vm6 = vcmask 31744   ;;  %v678_v24 = vmov 0.0   ;;  %vm354_vm8 = vcmask 64512  }
  0x2b   : > { %242 = vperm.xlu0 %574, %v239_v10   ;;  %s523_s23 = sshll.u32 %s725_s19, 3  ;;  %s499_s25 = sshll.u32 %s790_s29, 3 }
  0x2c   : > { %s522_s10 = sshll.u32 %s232_s9, 3  ;;  %s404_s6 = scalar_lea.hbm %s868_s4, %s523_s23 }
  0x2d   : > { %s235_s13 = scalar_lea.vmem %s865_s1, %s522_s10  ;;  %s230_s7 = scalar_lea.vmem [#allocation5], %s499_s25 }
  0x2e   : > { %v246_v1 = vld [vmem:[%s235_s13] sm:$0xff]  ;;  %s406_s8 = sshll.u32 %s230_s7, 4  ;;  %s408_s9 = sshll.u32 %s404_s6, 4  ;;  %s407_s8 = int_to_ptr.vmem [resolvable:$true] %s406_s8  ;;  %s409_s9 = int_to_ptr.hbm [resolvable:$true] %s408_s9 }
  0x2f   : > { %v247_v2 = vunpack.c.l.bf16 %v246_v1  ;;  %v248_v3 = vunpack.c.h.bf16 %v246_v1  ;;  %s393_s10 = scalar_lea.sflag [#allocation4], %s790_s29  ;;  %s621_s11 = sshra.s32 %s409_s9, 4  ;;  %s622_s11 = int_to_ptr.hbm [resolvable:$true] %s621_s11 }
  0x30   : > { %v285_v7 = vld.sshfl [vmem:[#allocation1] sm:$0xff pattern:$0x73625140]  ;;  %v286_v8 = vld.sshfl [vmem:[#allocation1 + $0x8] sm:$0xff pattern:$0x73625140]  ;;  %p628_p1 = scmp.lt.s32.totalorder %s622_s11, %s868_s4 }
  0x31   : > { %vm803_vm0 = vcmp.gt.f32.partialorder %v247_v2, 0.0  ;;  %vm807_vm1 = vcmp.gt.f32.partialorder %v248_v3, 0.0  ;;  %s623_s19 = scalar_lea.hbm %s622_s11, 8  ;;  %s627_s26 = scalar_lea.hbm %s868_s4, 16 }
  0x32   : > { %vm504_vm2 = vmpackc.low %vm803_vm0, %vm803_vm0  ;;  %v502_v25 = vsel %vm803_vm0, 1.0, %v678_v24  ;;  %v503_v26 = vsel %vm807_vm1, 1.0, %v678_v24  ;;  %p624_p6 = scmp.ne.s32.totalorder %s622_s11, %s623_s19  ;;  %p629_p3 = scmp.lt.s32.totalorder %s627_s26, %s623_s19 }
  0x33   : > { %509 = vmatpush.bf16.xpose.msk.msra.mxu2 %vm504_vm2, %v675_v6  ;;  %vm506_vm3 = vmpackc.low %vm807_vm1, %vm807_vm1  ;;  %505 = vmatpush.bf16.xpose.msk.msra.mxu0 %vm504_vm2, %v675_v6  ;;  %v255_v27 = vpack.c.bf16 %v502_v25, %v502_v25  ;;  %v256_v28 = vpack.c.bf16 %v503_v26, %v503_v26 }
  0x34   : > { %511 = vmatpush.bf16.xpose.msk.msra.mxu3 %vm506_vm3, %v675_v6  ;;  %507 = vmatpush.bf16.xpose.msk.msra.mxu1 %vm506_vm3, %v675_v6  ;;  %p625_p13 = pnand %p624_p6, %p754_p11  ;;  %p630_p4 = por %p629_p3, %p628_p1 }
  0x35   : > { %v359_v29 = vsel %vm319_vm5, %v255_v27, 0  ;;  %v362_v30 = vsel %vm319_vm5, %v256_v28, 0 }
  0x36   : > { %p626_p0 = pneg %p625_p13 }
  0x38   : > { %p631_p7 = pnand %p630_p4, %p626_p0 }
  0x3a   : > { %297 = vmatmul.bf16.vlgmr.msra.gmra.mxu2 %v285_v7  ;;  %265 = vmatmul.bf16.vlgmr.msra.gmra.mxu0 %v676_v9 }
  0x3b   : > { %310 = vmatmul.bf16.vlgmr.msra.gmra.mxu3 %v286_v8  ;;  %278 = vmatmul.bf16.vlgmr.msra.gmra.mxu1 %v676_v9 }
  0x3c   : > { %371 = vmatpush.bf16.msrb.mxu1 %v359_v29  ;;  %384 = vmatpush.bf16.msrb.mxu2 %v362_v30 }
  0x9d   : > { %v243_v34 = vpop.permute.xlu0 %242 }
  0xb7   : > { %v266_v12 = vpop.f32.mrf.mxu0 }
  0xb8   : > { %v279_v13 = vpop.f32.mrf.mxu1 }
  0xb9   : > { %v280_v14 = vadd.f32 %v279_v13, %v266_v12 }
  0xbb   : > { %vm348_vm4 = vcmp.gt.f32.partialorder %v280_v14, 0.0  ;;  %575 = vrcp.f32 %v280_v14 }
  0xbc   : > { %v349_v15 = vsel %vm348_vm4, 1, %v677_v11 }
  0xbd   : > { %v298_v16 = vpop.f32.mrf.mxu2  ;;  %v350_v36 = vperm.slane %v349_v15, 0 }
  0xbe   : > { %v311_v17 = vpop.f32.mrf.mxu3 }
  0xbf   : > { %v312_v18 = vadd.f32 %v311_v17, %v298_v16  ;;  %v268_v20 = vpop.f32.mrf.mxu0  ;;  %vm351_vm7 = vcmp.eq.s32.totalorder %v350_v36, 1 }
  0xc0   : > { %v281_v21 = vpop.f32.mrf.mxu1 }
  0xc1   : > { %512 = vmatpush.msk.msrb.mxu0 %vm319_vm5, %v312_v18  ;;  %v576_v31 = vpop.eup %575 }
  0xc2   : > { %513 = vmatmul.msk.f32.vlgmr.msrb.gmra.mxu0 %vm315_vm6, %v238_v19  ;;  %v344_v32 = vperm.slane %v576_v31, 0 }
  0xc5   : > { %v300_v22 = vpop.f32.mrf.mxu2 }
  0xc6   : > { %v313_v23 = vpop.f32.mrf.mxu3 }
 0x13f   : > { %v340_v33 = vpop.f32.mrf.mxu0 }
 0x140   : > { %v345_v35 = vmul.f32 %v344_v32, %v340_v33 }
 0x142   : > { %v346_v37 = vadd.f32 %v345_v35, %v243_v34 }
 0x144   : > { %v347_v38 = vmax.f32 %v346_v37, 0.0 }
 0x146   : > { %v352_v39 = vsel %vm351_vm7, %v347_v38, 0.0 }
 0x147   : > { %v353_v40 = vpack.c.bf16 %v352_v39, %v352_v39 }
 0x149   : > { %514 = vmatmul.msk.bf16.vlgmr.msrb.gmra.mxu1 %vm354_vm8, %v353_v40  ;;  %515 = vmatmul.msk.bf16.vlgmr.msrb.gmra.mxu2 %vm354_vm8, %v353_v40 }
 0x1c6   : > { %v373_v41 = vpop.f32.mrf.mxu1 }
 0x1cc   : > { %v386_v42 = vpop.f32.mrf.mxu2 }
 0x1cd   : > { %v390_v43 = vpack.c.bf16 %v386_v42, %v373_v41 }
 0x1ce   : > { %v375_v44 = vpop.f32.mrf.mxu1 }
 0x1cf   : > { %391 = vst [vmem:[%s230_s7] sm:$0xff] %v390_v43 }
 0x1d0   : > { %634 = shalt.err (!%p631_p7)
}
 0x1d1   : > { %526 = dma.vmem_to_hbm [thread:$0]  (%p754_p11), %s407_s8, 128, %s409_s9, %s393_s10  }
 0x1d4   : > { %v388_v45 = vpop.f32.mrf.mxu2 }
 0x1d5 PF: > { %s420_s29 = sand.u32 1, %s661_s15   ;;  %p878_p5 = scmp.ge.s32.totalorder %s673_s18, 2 }
 0x1d6   : > { %s421_s22 = scalar_lea.sflag [#allocation4], %s420_s29 }
 0x1d7   : > { %p533_p8 = pnand %p878_p5, %p758_p12 }
 0x1d9   : > { %p534_p10 = pneg %p533_p8 }
 0x1db   : > { %656 = dma.done.wait (%p534_p10), %s421_s22, 128  }
 0x1dc   : > { %658 = vsyncadd (%p534_p10), %s421_s22, 4294967168  ;;  %p17_p2 = scmp.ge.s32.totalorder %s729_s21, 4   ;;  %s879_s15 = smov %s665_s16 }
 0x1dd   : > { %s880_s16 = smov %s669_s17  ;;  %s881_s17 = smov %s741_s24 }
 0x1de   : > { %s882_s18 = smov %s729_s21  ;;  %19 = sbr.rel (!%p17_p2) target bundleno = 5 (0x5), region = 84 }
 0x1e3   :  { %427 = vsyncpa [#allocation3], 1 }
 0x1e4   :  { %429 = vsyncpa [#allocation3 + $0x1], 1 }
 0x1e5   :  { %430 = vsyncpa [#allocation4], 1 }
 0x1e6   :  { %432 = vsyncpa [#allocation4 + $0x1], 1 }

</bundles_post_ra>
